<compile_context>
chip_gen: v7x
topology: tpu7x:2x2x1
jax: 0.10.0
libtpu: 0.0.40
codegen_flags: <defaults>
</compile_context>

<pallas_src>
import functools

import jax
import jax.numpy as jnp
from jax.experimental import pallas as pl
from jax.experimental.pallas import tpu as pltpu


def _round_up(x, m):
    return ((x + m - 1) // m) * m


def bi_attention_kernel(nodes_ref, query_ref, w_ref, qbias_ref, nbias_ref, out_ref):
    """One grid step = Bb batch elements.

    nodes_ref : [Bb, Np, Hp]    query_ref : [Bb, Qp, Hp]
    w_ref     : [3, Hp]         (rows: w_nodes, w_query, w_product)
    qbias_ref : [1, Qp]         (0 valid / -1e30 padded query positions)
    nbias_ref : [Np, 1]         (0 valid / -1e30 padded node rows)
    out_ref   : [Bb, Np, 4*Hp]
    """
    nodes = nodes_ref[...]                 # [Bb, Np, Hp]
    query = query_ref[...]                 # [Bb, Qp, Hp]
    w = w_ref[...]                         # [3, Hp]
    w_n = w[0:1]                           # [1, Hp]
    w_q = w[1:2]
    w_p = w[2:3]
    qbias = qbias_ref[...]                 # [1, Qp]
    nbias = nbias_ref[...]                 # [Np, 1]

    hp = nodes.shape[-1]

    # similarity[b,n,q] = <nodes, w_n> + <query, w_q> + <nodes*w_p, query>
    # The <query, w_q> term is folded into the MXU contraction by adding w_q
    # to the LHS (zero padded rows/lanes keep this exact).
    s_n = jnp.sum(nodes * w_n[None], axis=-1, keepdims=True)                 # [Bb, Np, 1]
    sim = jnp.einsum('bnh,bqh->bnq', nodes * w_p[None] + w_q[None], query,
                     preferred_element_type=jnp.float32)                      # [Bb, Np, Qp]
    sim = sim + s_n + qbias[None]                                             # mask padded q

    # softmax over query positions (lane axis) -> nodes2query
    row_max = jnp.max(sim, axis=-1, keepdims=True)                            # [Bb, Np, 1]
    p = jnp.exp(sim - row_max)
    a = p / jnp.sum(p, axis=-1, keepdims=True)
    nodes2query = jnp.einsum('bnq,bqh->bnh', a, query,
                             preferred_element_type=jnp.float32)              # [Bb, Np, Hp]

    # softmax over nodes of the per-node max similarity -> query2nodes
    rm = row_max + nbias[None]                                                # mask padded n
    col_max = jnp.max(rm, axis=1, keepdims=True)                              # [Bb, 1, 1]
    e = jnp.exp(rm - col_max)                                                 # [Bb, Np, 1]
    b_soft = e / jnp.sum(e, axis=1, keepdims=True)
    query2nodes = jnp.sum(b_soft * nodes, axis=1, keepdims=True)              # [Bb, 1, Hp]

    # four lane-aligned output slabs (same order as the PyTorch concat)
    out_ref[:, :, 0:hp] = nodes.astype(out_ref.dtype)
    out_ref[:, :, hp:2 * hp] = nodes2query.astype(out_ref.dtype)
    out_ref[:, :, 2 * hp:3 * hp] = (nodes * nodes2query).astype(out_ref.dtype)
    out_ref[:, :, 3 * hp:4 * hp] = (nodes * query2nodes).astype(out_ref.dtype)


@functools.partial(jax.jit, static_argnames=("batch_block",))
def bi_attention(nodes_compress, query_compress, w_att, *, batch_block=8):
    """Pallas BiAttention forward.

    nodes_compress : [B, N, H]    query_compress : [B, Q, H]
    w_att          : [3*H]        (Linear(3H, 1, bias=False).weight[0])
    returns        : [B, N, 4*H]
    """
    B, N, H = nodes_compress.shape
    Q = query_compress.shape[1]
    dtype = nodes_compress.dtype

    Hp = _round_up(H, 128)
    Qp = _round_up(Q, 128)
    Np = _round_up(N, 8)
    Bb = min(B, batch_block)
    Bp = _round_up(B, Bb)

    nodes_p = jnp.zeros((Bp, Np, Hp), dtype).at[:B, :N, :H].set(nodes_compress)
    query_p = jnp.zeros((Bp, Qp, Hp), dtype).at[:B, :Q, :H].set(query_compress)
    w_p = jnp.zeros((3, Hp), dtype).at[:, :H].set(w_att.reshape(3, H).astype(dtype))
    qbias = jnp.where(jnp.arange(Qp) < Q, 0.0, -1e30).astype(dtype)[None, :]   # [1, Qp]
    nbias = jnp.where(jnp.arange(Np) < N, 0.0, -1e30).astype(dtype)[:, None]   # [Np, 1]

    grid = (Bp // Bb,)
    in_specs = [
        pl.BlockSpec((Bb, Np, Hp), lambda i: (i, 0, 0)),      # nodes
        pl.BlockSpec((Bb, Qp, Hp), lambda i: (i, 0, 0)),      # query
        pl.BlockSpec((3, Hp), lambda i: (0, 0)),              # attention weights
        pl.BlockSpec((1, Qp), lambda i: (0, 0)),              # query-padding bias
        pl.BlockSpec((Np, 1), lambda i: (0, 0)),              # node-padding bias
    ]
    out_spec = pl.BlockSpec((Bb, Np, 4 * Hp), lambda i: (i, 0, 0))

    # Explicit VMEM budget only if the (double-buffered) blocks outgrow the
    # default scoped limit — relevant for large N/Q/H, especially on v7x.
    elem = jnp.dtype(dtype).itemsize
    vmem_est = 2 * elem * (Bb * Np * Hp + Bb * Qp * Hp + Bb * Np * 4 * Hp) \
        + elem * (3 * Hp + Qp + Np) + (4 << 20)
    cp_kwargs = {}
    if vmem_est > (32 << 20):
        cp_kwargs["vmem_limit_bytes"] = int(min(vmem_est, 100 << 20))

    out_p = pl.pallas_call(
        bi_attention_kernel,
        out_shape=jax.ShapeDtypeStruct((Bp, Np, 4 * Hp), dtype),
        grid_spec=pltpu.PrefetchScalarGridSpec(
            num_scalar_prefetch=0,
            grid=grid,
            in_specs=in_specs,
            out_specs=out_spec,
        ),
        compiler_params=pltpu.CompilerParams(
            dimension_semantics=("parallel",), **cp_kwargs),
    )(nodes_p, query_p, w_p, qbias, nbias)

    # strip padding: [Bp, Np, 4*Hp] -> [B, N, 4, Hp] -> [B, N, 4*H]
    return out_p[:B, :N].reshape(B, N, 4, Hp)[..., :H].reshape(B, N, 4 * H)


def bi_attention_ref(nodes_compress, query_compress, w_att):
    """Pure-JAX reference mirroring the PyTorch forward exactly."""
    B, N, H = nodes_compress.shape
    Q = query_compress.shape[1]
    exp_q = jnp.broadcast_to(query_compress[:, None, :, :], (B, N, Q, H))
    exp_n = jnp.broadcast_to(nodes_compress[:, :, None, :], (B, N, Q, H))
    cat = jnp.concatenate([exp_n, exp_q, exp_n * exp_q], axis=-1)             # [B, N, Q, 3H]
    similarity = jnp.einsum('bnqk,k->bnq', cat, w_att)                        # Linear(3H,1).squeeze(-1)
    nodes2query = jax.nn.softmax(similarity, axis=-1) @ query_compress        # [B, N, H]
    b = jax.nn.softmax(jnp.max(similarity, axis=-1), axis=-1)                 # [B, N]
    query2nodes = jnp.einsum('bn,bnh->bh', b, nodes_compress)[:, None, :]
    query2nodes = jnp.broadcast_to(query2nodes, nodes_compress.shape)
    return jnp.concatenate(
        [nodes_compress, nodes2query,
         nodes_compress * nodes2query, nodes_compress * query2nodes], axis=-1)


if __name__ == "__main__":
    # max_nodes = 16, query_size = 8, hidden_size = 32
    B, N, Q, H = 2, 16, 8, 32

    key = jax.random.PRNGKey(0)
    k_n, k_q, k_w = jax.random.split(key, 3)

    nodes_compress = jax.random.normal(k_n, (B, N, H), jnp.float32)
    query_compress = jax.random.normal(k_q, (B, Q, H), jnp.float32)
    # nn.Linear(3H, 1, bias=False) default init: uniform(+-1/sqrt(3H))
    bnd = 1.0 / jnp.sqrt(3.0 * H)
    w_att = jax.random.uniform(k_w, (3 * H,), jnp.float32, -bnd, bnd)

    # NOTE: the PyTorch forward also receives `nodes_hidden`, but never uses it.

    out = bi_attention(nodes_compress, query_compress, w_att, batch_block=8)
    out = jax.block_until_ready(out)

    ref = bi_attention_ref(nodes_compress, query_compress, w_att)
    if not jnp.allclose(out, ref, atol=1e-4, rtol=1e-4):
        err = jnp.max(jnp.abs(out - ref))
        raise AssertionError(f"Pallas kernel output does not match JAX reference (max err {err})")

    print("KERNEL_OK")
</pallas_src>

<mosaic_0001>
module attributes {stable_mosaic.version = 11 : i64} {
  func.func @bi_attention_kernel(%arg0: i32, %arg1: memref<2x16x128xf32, #tpu.memory_space<vmem>>, %arg2: memref<2x128x128xf32, #tpu.memory_space<vmem>>, %arg3: memref<3x128xf32, #tpu.memory_space<vmem>>, %arg4: memref<1x128xf32, #tpu.memory_space<vmem>>, %arg5: memref<16x1xf32, #tpu.memory_space<vmem>>, %arg6: memref<2x16x512xf32, #tpu.memory_space<vmem>>) attributes {dimension_semantics = [#tpu.dimension_semantics<parallel>], iteration_bounds = array<i64: 1>, scalar_prefetch = 0 : i64, scratch_operands = 0 : i64, tpu.core_type = #tpu.core_type<tc>, window_params = [{transform_indices = @transform_0, window_bounds = array<i64: 2, 16, 128>}, {transform_indices = @transform_1, window_bounds = array<i64: 2, 128, 128>}, {pipeline_mode = #tpu.pipeline_mode<synchronous>, transform_indices = @transform_2, window_bounds = array<i64: 3, 128>}, {pipeline_mode = #tpu.pipeline_mode<synchronous>, transform_indices = @transform_3, window_bounds = array<i64: 1, 128>}, {pipeline_mode = #tpu.pipeline_mode<synchronous>, transform_indices = @transform_4, window_bounds = array<i64: 16, 1>}, {transform_indices = @transform_5, window_bounds = array<i64: 2, 16, 512>}]} {
    %c0 = arith.constant 0 : index
    %c0_0 = arith.constant 0 : index
    %c0_1 = arith.constant 0 : index
    %0 = vector.load %arg1[%c0, %c0_0, %c0_1] : memref<2x16x128xf32, #tpu.memory_space<vmem>>, vector<2x16x128xf32>
    %c0_2 = arith.constant 0 : index
    %c0_3 = arith.constant 0 : index
    %c0_4 = arith.constant 0 : index
    %1 = vector.load %arg2[%c0_2, %c0_3, %c0_4] : memref<2x128x128xf32, #tpu.memory_space<vmem>>, vector<2x128x128xf32>
    %c0_5 = arith.constant 0 : index
    %c0_6 = arith.constant 0 : index
    %2 = vector.load %arg3[%c0_5, %c0_6] : memref<3x128xf32, #tpu.memory_space<vmem>>, vector<3x128xf32>
    %3 = vector.extract_strided_slice %2 {offsets = [0, 0], sizes = [1, 128], strides = [1, 1]} : vector<3x128xf32> to vector<1x128xf32>
    %4 = vector.extract_strided_slice %2 {offsets = [1, 0], sizes = [1, 128], strides = [1, 1]} : vector<3x128xf32> to vector<1x128xf32>
    %5 = vector.extract_strided_slice %2 {offsets = [2, 0], sizes = [1, 128], strides = [1, 1]} : vector<3x128xf32> to vector<1x128xf32>
    %c0_7 = arith.constant 0 : index
    %c0_8 = arith.constant 0 : index
    %6 = vector.load %arg4[%c0_7, %c0_8] : memref<1x128xf32, #tpu.memory_space<vmem>>, vector<1x128xf32>
    %c0_9 = arith.constant 0 : index
    %c0_10 = arith.constant 0 : index
    %7 = vector.load %arg5[%c0_9, %c0_10] : memref<16x1xf32, #tpu.memory_space<vmem>>, vector<16x1xf32>
    %8 = vector.shape_cast %3 : vector<1x128xf32> to vector<1x1x128xf32>
    %9 = vector.broadcast %8 : vector<1x1x128xf32> to vector<2x16x128xf32>
    %10 = arith.mulf %0, %9 : vector<2x16x128xf32>
    %cst = arith.constant dense<0.000000e+00> : vector<2x16xf32>
    %11 = vector.multi_reduction <add>, %10, %cst [2] : vector<2x16x128xf32> to vector<2x16xf32>
    %12 = vector.shape_cast %11 : vector<2x16xf32> to vector<2x16x1xf32>
    %13 = vector.shape_cast %5 : vector<1x128xf32> to vector<1x1x128xf32>
    %14 = vector.broadcast %13 : vector<1x1x128xf32> to vector<2x16x128xf32>
    %15 = arith.mulf %0, %14 : vector<2x16x128xf32>
    %16 = vector.shape_cast %4 : vector<1x128xf32> to vector<1x1x128xf32>
    %17 = vector.broadcast %16 : vector<1x1x128xf32> to vector<2x16x128xf32>
    %18 = arith.addf %15, %17 : vector<2x16x128xf32>
    "tpu.trace_start"() <{level = 10 : i32, message = "bnh,bqh->bnq"}> : () -> ()
    %cst_11 = arith.constant dense<0.000000e+00> : vector<2x16x128xf32>
    %19 = tpu.matmul %18, %1, %cst_11 {dimension_numbers = #tpu.dot_dimension_numbers<[2], [2], [1], [1], [0, 0, 0, 1, 1, 1], [0], [0]>} : vector<2x16x128xf32>, vector<2x128x128xf32>, vector<2x16x128xf32> -> vector<2x16x128xf32>
    "tpu.trace_stop"() : () -> ()
    %20 = vector.broadcast %12 : vector<2x16x1xf32> to vector<2x16x128xf32>
    %21 = arith.addf %19, %20 : vector<2x16x128xf32>
    %22 = vector.shape_cast %6 : vector<1x128xf32> to vector<1x1x128xf32>
    %23 = vector.broadcast %22 : vector<1x1x128xf32> to vector<2x16x128xf32>
    %24 = arith.addf %21, %23 : vector<2x16x128xf32>
    %cst_12 = arith.constant dense<0xFF800000> : vector<2x16xf32>
    %25 = vector.multi_reduction <maximumf>, %24, %cst_12 [2] : vector<2x16x128xf32> to vector<2x16xf32>
    %26 = vector.shape_cast %25 : vector<2x16xf32> to vector<2x16x1xf32>
    %27 = vector.broadcast %26 : vector<2x16x1xf32> to vector<2x16x128xf32>
    %28 = arith.subf %24, %27 : vector<2x16x128xf32>
    %29 = math.exp %28 : vector<2x16x128xf32>
    %cst_13 = arith.constant dense<0.000000e+00> : vector<2x16xf32>
    %30 = vector.multi_reduction <add>, %29, %cst_13 [2] : vector<2x16x128xf32> to vector<2x16xf32>
    %31 = vector.shape_cast %30 : vector<2x16xf32> to vector<2x16x1xf32>
    %32 = vector.broadcast %31 : vector<2x16x1xf32> to vector<2x16x128xf32>
    %33 = arith.divf %29, %32 : vector<2x16x128xf32>
    "tpu.trace_start"() <{level = 10 : i32, message = "bnq,bqh->bnh"}> : () -> ()
    %cst_14 = arith.constant dense<0.000000e+00> : vector<2x16x128xf32>
    %34 = tpu.matmul %33, %1, %cst_14 {dimension_numbers = #tpu.dot_dimension_numbers<[2], [1], [1], [2], [0, 0, 0, 1, 1, 2], [0], [0]>} : vector<2x16x128xf32>, vector<2x128x128xf32>, vector<2x16x128xf32> -> vector<2x16x128xf32>
    "tpu.trace_stop"() : () -> ()
    %35 = vector.shape_cast %7 : vector<16x1xf32> to vector<1x16x1xf32>
    %36 = vector.broadcast %35 : vector<1x16x1xf32> to vector<2x16x1xf32>
    %37 = arith.addf %26, %36 : vector<2x16x1xf32>
    %cst_15 = arith.constant dense<0xFF800000> : vector<2x1xf32>
    %38 = vector.multi_reduction <maximumf>, %37, %cst_15 [1] : vector<2x16x1xf32> to vector<2x1xf32>
    %39 = vector.shape_cast %38 : vector<2x1xf32> to vector<2x1x1xf32>
    %40 = vector.broadcast %39 : vector<2x1x1xf32> to vector<2x16x1xf32>
    %41 = arith.subf %37, %40 : vector<2x16x1xf32>
    %42 = math.exp %41 : vector<2x16x1xf32>
    %cst_16 = arith.constant dense<0.000000e+00> : vector<2x1xf32>
    %43 = vector.multi_reduction <add>, %42, %cst_16 [1] : vector<2x16x1xf32> to vector<2x1xf32>
    %44 = vector.shape_cast %43 : vector<2x1xf32> to vector<2x1x1xf32>
    %45 = vector.broadcast %44 : vector<2x1x1xf32> to vector<2x16x1xf32>
    %46 = arith.divf %42, %45 : vector<2x16x1xf32>
    %47 = vector.broadcast %46 : vector<2x16x1xf32> to vector<2x16x128xf32>
    %48 = arith.mulf %47, %0 : vector<2x16x128xf32>
    %cst_17 = arith.constant dense<0.000000e+00> : vector<2x128xf32>
    %49 = vector.multi_reduction <add>, %48, %cst_17 [1] : vector<2x16x128xf32> to vector<2x128xf32>
    %50 = vector.shape_cast %49 : vector<2x128xf32> to vector<2x1x128xf32>
    %c0_18 = arith.constant 0 : index
    %c0_19 = arith.constant 0 : index
    %c0_20 = arith.constant 0 : index
    %51 = vector.load %arg6[%c0_18, %c0_19, %c0_20] : memref<2x16x512xf32, #tpu.memory_space<vmem>>, vector<2x16x128xf32>
    tpu.vector_store %arg6[%c0_18, %c0_19, %c0_20], %0 {strides = array<i32>} : memref<2x16x512xf32, #tpu.memory_space<vmem>>, vector<2x16x128xf32>,
    %c0_21 = arith.constant 0 : index
    %c0_22 = arith.constant 0 : index
    %c128 = arith.constant 128 : index
    %52 = vector.load %arg6[%c0_21, %c0_22, %c128] : memref<2x16x512xf32, #tpu.memory_space<vmem>>, vector<2x16x128xf32>
    tpu.vector_store %arg6[%c0_21, %c0_22, %c128], %34 {strides = array<i32>} : memref<2x16x512xf32, #tpu.memory_space<vmem>>, vector<2x16x128xf32>,
    %53 = arith.mulf %0, %34 : vector<2x16x128xf32>
    %c0_23 = arith.constant 0 : index
    %c0_24 = arith.constant 0 : index
    %c256 = arith.constant 256 : index
    %54 = vector.load %arg6[%c0_23, %c0_24, %c256] : memref<2x16x512xf32, #tpu.memory_space<vmem>>, vector<2x16x128xf32>
    tpu.vector_store %arg6[%c0_23, %c0_24, %c256], %53 {strides = array<i32>} : memref<2x16x512xf32, #tpu.memory_space<vmem>>, vector<2x16x128xf32>,
    %55 = vector.broadcast %50 : vector<2x1x128xf32> to vector<2x16x128xf32>
    %56 = arith.mulf %0, %55 : vector<2x16x128xf32>
    %c0_25 = arith.constant 0 : index
    %c0_26 = arith.constant 0 : index
    %c384 = arith.constant 384 : index
    %57 = vector.load %arg6[%c0_25, %c0_26, %c384] : memref<2x16x512xf32, #tpu.memory_space<vmem>>, vector<2x16x128xf32>
    tpu.vector_store %arg6[%c0_25, %c0_26, %c384], %56 {strides = array<i32>} : memref<2x16x512xf32, #tpu.memory_space<vmem>>, vector<2x16x128xf32>,
    return
  }
  func.func @transform_0(%arg0: i32) -> (i32, i32, i32) {
    %c0_i32 = arith.constant 0 : i32
    %c0_i32_0 = arith.constant 0 : i32
    %c0_i32_1 = arith.constant 0 : i32
    return %arg0, %c0_i32, %c0_i32_0 : i32, i32, i32
  }
  func.func @transform_1(%arg0: i32) -> (i32, i32, i32) {
    %c0_i32 = arith.constant 0 : i32
    %c0_i32_0 = arith.constant 0 : i32
    %c0_i32_1 = arith.constant 0 : i32
    return %arg0, %c0_i32, %c0_i32_0 : i32, i32, i32
  }
  func.func @transform_2(%arg0: i32) -> (i32, i32) {
    %c0_i32 = arith.constant 0 : i32
    %c0_i32_0 = arith.constant 0 : i32
    %c0_i32_1 = arith.constant 0 : i32
    return %c0_i32, %c0_i32_0 : i32, i32
  }
  func.func @transform_3(%arg0: i32) -> (i32, i32) {
    %c0_i32 = arith.constant 0 : i32
    %c0_i32_0 = arith.constant 0 : i32
    %c0_i32_1 = arith.constant 0 : i32
    return %c0_i32, %c0_i32_0 : i32, i32
  }
  func.func @transform_4(%arg0: i32) -> (i32, i32) {
    %c0_i32 = arith.constant 0 : i32
    %c0_i32_0 = arith.constant 0 : i32
    %c0_i32_1 = arith.constant 0 : i32
    return %c0_i32, %c0_i32_0 : i32, i32
  }
  func.func @transform_5(%arg0: i32) -> (i32, i32, i32) {
    %c0_i32 = arith.constant 0 : i32
    %c0_i32_0 = arith.constant 0 : i32
    %c0_i32_1 = arith.constant 0 : i32
    return %arg0, %c0_i32, %c0_i32_0 : i32, i32, i32
  }
}

</mosaic_0001>

<bundles_post_ra>
// kernel: bi_attention.1
= control target key start
LH: loop header
LB: loop body
LE: loop exit
PB: predicated region body
PF: predicated region fallthrough
CT: control target
= control target key end

     0   :  { %v60_v3 = vlaneseq  ;;  %vm442_vm0 = vcmask 7168   ;;  %s1250_s1 = inlined_call_operand.vmem [shape: f32[2,128,128], index: 1, kind: input, shape index: {}]   ;;  %s1251_s0 = inlined_call_operand.vmem [shape: f32[2,16,128], index: 0, kind: input, shape index: {}]   ;;  %s1252_s2 = inlined_call_operand.vmem [shape: f32[3,128], index: 2, kind: input, shape index: {}]   ;;  %s1253_s5 = inlined_call_operand.vmem [shape: f32[2,16,512], index: 5, kind: output, shape index: {}]   ;;  %s1254_s3 = inlined_call_operand.vmem [shape: f32[1,128], index: 3, kind: input, shape index: {}]   ;;  %s1255_s4 = inlined_call_operand.vmem [shape: f32[16,1], index: 4, kind: input, shape index: {}]  }
   0x1   :  { %v24_v0 = vld [vmem:[%s1250_s1] sm:$0xff]  ;;  %v25_v1 = vld [vmem:[%s1250_s1 + $0x8] sm:$0xff]  ;;  %v26_v6 = vld [vmem:[%s1250_s1 + $0x10] sm:$0xff] }
   0x2   :  { %v40_v2 = vld [vmem:[%s1250_s1 + $0x80] sm:$0xff]  ;;  %v975_v4 = vpack.c.bf16 %v25_v1, %v24_v0  ;;  %v41_v5 = vld [vmem:[%s1250_s1 + $0x88] sm:$0xff]  ;;  %v27_v7 = vld [vmem:[%s1250_s1 + $0x18] sm:$0xff]  ;;  %v61_v13 = vshrl.u32 %v60_v3, 7 }
   0x3   :  { %v986_v8 = vpack.c.bf16 %v41_v5, %v40_v2  ;;  %v988_v9 = vpack.c.bf16 %v27_v7, %v26_v6  ;;  %v42_v10 = vld [vmem:[%s1250_s1 + $0x90] sm:$0xff]  ;;  %v43_v11 = vld [vmem:[%s1250_s1 + $0x98] sm:$0xff]  ;;  %v28_v14 = vld [vmem:[%s1250_s1 + $0x20] sm:$0xff] }
   0x4   :  { %777 = vmatprep.subr.bf16.mxu0 %v975_v4  ;;  %v997_v12 = vpack.c.bf16 %v43_v11, %v42_v10  ;;  %v29_v15 = vld [vmem:[%s1250_s1 + $0x28] sm:$0xff]  ;;  %v44_v16 = vld [vmem:[%s1250_s1 + $0xa0] sm:$0xff]  ;;  %v78_v18 = vsub.s32 2, %v61_v13  ;;  %v86_v19 = vsub.s32 1, %v61_v13  ;;  %v62_v20 = vsub.s32 0, %v61_v13  ;;  %v1035_v25 = vld [vmem:[%s1251_s0 + $0x10] sm:$0xff] }
   0x5   :  { %809 = vmatprep.subr.bf16.mxu1 %v986_v8  ;;  %779 = vmatpush3.bf16.xpose.msra.mxu0 %v975_v4  ;;  %v45_v17 = vld [vmem:[%s1250_s1 + $0xa8] sm:$0xff]  ;;  %v1016_v21 = vpack.c.bf16 %v29_v15, %v28_v14  ;;  %v1023_v23 = vld [vmem:[%s1251_s0] sm:$0xff]  ;;  %537 = vst [vmem:[%s1253_s5 + $0x40] sm:$0xff] %v1035_v25  ;;  %v1058_v29 = vld [vmem:[%s1251_s0 + $0x18] sm:$0xff] }
   0x6   :  { %811 = vmatpush3.bf16.xpose.msra.mxu1 %v986_v8  ;;  %781 = vmatprep.subr.bf16.mxu0 %v988_v9  ;;  %v1018_v22 = vpack.c.bf16 %v45_v17, %v44_v16  ;;  %v56_v24 = vld [vmem:[%s1252_s2] sm:$0x7]  ;;  %535 = vst [vmem:[%s1253_s5] sm:$0xff] %v1023_v23  ;;  %v1040_v26 = vld [vmem:[%s1251_s0 + $0x8] sm:$0xff]  ;;  %538 = vst [vmem:[%s1253_s5 + $0x60] sm:$0xff] %v1058_v29 }
   0x7   :  { %813 = vmatprep.subr.bf16.mxu1 %v997_v12  ;;  %v1043_v27 = vrot.slane %v56_v24, %v78_v18  ;;  %v1045_v28 = vrot.slane %v56_v24, %v86_v19  ;;  %536 = vst [vmem:[%s1253_s5 + $0x20] sm:$0xff] %v1040_v26  ;;  %v63_v30 = vrot.slane %v56_v24, %v62_v20  ;;  %v30_v31 = vld [vmem:[%s1250_s1 + $0x30] sm:$0xff]  ;;  %v31_v32 = vld [vmem:[%s1250_s1 + $0x38] sm:$0xff]  ;;  %v32_v45 = vld [vmem:[%s1250_s1 + $0x40] sm:$0xff] }
   0x8   :  { %v46_v35 = vld [vmem:[%s1250_s1 + $0xb0] sm:$0xff]  ;;  %v47_v36 = vld [vmem:[%s1250_s1 + $0xb8] sm:$0xff]  ;;  %v1087_v41 = vpack.c.bf16 %v31_v32, %v30_v31  ;;  %v33_v46 = vld [vmem:[%s1250_s1 + $0x48] sm:$0xff] }
   0x9   :  { %v80_v33 = vmul.f32 %v1043_v27, %v1023_v23  ;;  %v82_v34 = vmul.f32 %v1043_v27, %v1035_v25  ;;  %v65_v37 = vmul.f32 %v63_v30, %v1040_v26  ;;  %v64_v38 = vmul.f32 %v63_v30, %v1023_v23  ;;  %v48_v47 = vld [vmem:[%s1250_s1 + $0xc0] sm:$0xff]  ;;  %v49_v48 = vld [vmem:[%s1250_s1 + $0xc8] sm:$0xff]  ;;  %v34_v51 = vld [vmem:[%s1250_s1 + $0x50] sm:$0xff] }
   0xa   :  { %v1089_v42 = vpack.c.bf16 %v47_v36, %v46_v35  ;;  %v67_v43 = vmul.f32 %v63_v30, %v1058_v29  ;;  %v66_v44 = vmul.f32 %v63_v30, %v1035_v25  ;;  %v792_v49 = vpack.c.bf16 %v33_v46, %v32_v45  ;;  %v35_v52 = vld [vmem:[%s1250_s1 + $0x58] sm:$0xff]  ;;  %v50_v53 = vld [vmem:[%s1250_s1 + $0xd0] sm:$0xff]  ;;  %v36_v57 = vld [vmem:[%s1250_s1 + $0x60] sm:$0xff] }
   0xb   :  { %v88_v39 = vadd.f32 %v1045_v28, %v80_v33  ;;  %v90_v40 = vadd.f32 %v1045_v28, %v82_v34  ;;  %70 = vadd.xlane.f32.xlu1 %v65_v37  ;;  %68 = vadd.xlane.f32.xlu0 %v64_v38  ;;  %v824_v50 = vpack.c.bf16 %v49_v48, %v48_v47  ;;  %v51_v54 = vld [vmem:[%s1250_s1 + $0xd8] sm:$0xff]  ;;  %v37_v58 = vld [vmem:[%s1250_s1 + $0x68] sm:$0xff]  ;;  %v52_v59 = vld [vmem:[%s1250_s1 + $0xe0] sm:$0xff]  ;;  %v935_v30 = vmov 0  }
   0xc   :  { %v796_v55 = vpack.c.bf16 %v35_v52, %v34_v51  ;;  %v828_v56 = vpack.c.bf16 %v51_v54, %v50_v53  ;;  %v53_v60 = vld [vmem:[%s1250_s1 + $0xe8] sm:$0xff]  ;;  %v800_v61 = vpack.c.bf16 %v37_v58, %v36_v57  ;;  %v38_v63 = vld [vmem:[%s1250_s1 + $0x70] sm:$0xff]  ;;  %v39_v0 = vld [vmem:[%s1250_s1 + $0x78] sm:$0xff]  ;;  %v81_v6 = vmul.f32 %v1043_v27, %v1040_v26  ;;  %906 = vset.pattern.permute.xlu1 %v935_v30 }
   0xd   :  { %783 = vmatpush3.bf16.xpose.msra.mxu0 %v988_v9  ;;  %668 = vmatprep.mubr.f32.mxu0 %v88_v39  ;;  %v832_v62 = vpack.c.bf16 %v53_v60, %v52_v59  ;;  %v54_v1 = vld [vmem:[%s1250_s1 + $0xf0] sm:$0xff]  ;;  %v55_v2 = vld [vmem:[%s1250_s1 + $0xf8] sm:$0xff]  ;;  %v804_v3 = vpack.c.bf16 %v39_v0, %v38_v63  ;;  %v83_v7 = vmul.f32 %v1043_v27, %v1058_v29  ;;  %v563_v15 = vld [vmem:[%s1254_s3] ss:$0 sm:$0xff] }
   0xe   :  { %815 = vmatpush3.bf16.xpose.msra.mxu1 %v997_v12  ;;  %785 = vmatprep.subr.bf16.mxu0 %v1016_v21  ;;  %v836_v5 = vpack.c.bf16 %v55_v2, %v54_v1  ;;  %v89_v10 = vadd.f32 %v1045_v28, %v81_v6  ;;  %v58_v31 = vld [vmem:[%s1255_s4] sm:$0xff]  ;;  %v59_v36 = vld [vmem:[%s1255_s4 + $0x8] sm:$0xff] }
   0xf   :  { %817 = vmatprep.subr.bf16.mxu1 %v1018_v22  ;;  %703 = vmatprep.mubr.f32.mxu1 %v90_v40  ;;  %v91_v11 = vadd.f32 %v1045_v28, %v83_v7 }
  0x10   :  { %74 = vadd.xlane.f32.xlu1 %v67_v43  ;;  %72 = vadd.xlane.f32.xlu0 %v66_v44 }
  0x11   :  { %905 = vset.pattern.permute.xlu0 %v935_v30 }
  0x15   :  { %787 = vmatpush3.bf16.xpose.msra.mxu0 %v1016_v21 }
  0x16   :  { %819 = vmatpush3.bf16.xpose.msra.mxu1 %v1018_v22  ;;  %789 = vmatprep.subr.bf16.mxu0 %v1087_v41 }
  0x17   :  { %821 = vmatprep.subr.bf16.mxu1 %v1089_v42 }
  0x1d   :  { %791 = vmatpush3.bf16.xpose.msra.mxu0 %v1087_v41 }
  0x1e   :  { %823 = vmatpush3.bf16.xpose.msra.mxu1 %v1089_v42  ;;  %793 = vmatprep.subr.bf16.mxu0 %v792_v49 }
  0x1f   :  { %825 = vmatprep.subr.bf16.mxu1 %v824_v50 }
  0x25   :  { %795 = vmatpush3.bf16.xpose.msra.mxu0 %v792_v49 }
  0x26   :  { %827 = vmatpush3.bf16.xpose.msra.mxu1 %v824_v50  ;;  %797 = vmatprep.subr.bf16.mxu0 %v796_v55 }
  0x27   :  { %829 = vmatprep.subr.bf16.mxu1 %v828_v56 }
  0x2d   :  { %799 = vmatpush3.bf16.xpose.msra.mxu0 %v796_v55 }
  0x2e   :  { %831 = vmatpush3.bf16.xpose.msra.mxu1 %v828_v56  ;;  %801 = vmatprep.subr.bf16.mxu0 %v800_v61 }
  0x2f   :  { %833 = vmatprep.subr.bf16.mxu1 %v832_v62 }
  0x35   :  { %803 = vmatpush3.bf16.xpose.msra.mxu0 %v800_v61 }
  0x36   :  { %835 = vmatpush3.bf16.xpose.msra.mxu1 %v832_v62  ;;  %805 = vmatprep.subr.bf16.mxu0 %v804_v3 }
  0x37   :  { %837 = vmatprep.subr.bf16.mxu1 %v836_v5 }
  0x3d   :  { %807 = vmatpush3.bf16.xpose.msra.mxu0 %v804_v3 }
  0x3e   :  { %839 = vmatpush3.bf16.xpose.msra.mxu1 %v836_v5  ;;  %841 = vmatprep.subr.bf16.mxu0 %v975_v4 }
  0x3f   :  { %873 = vmatprep.subr.bf16.mxu1 %v986_v8 }
  0x44   :  { %669 = vmatmul.mubr.f32.vlgmr.msra.gmra.mrb[0].mxu0 %v89_v10 }
  0x45   :  { %704 = vmatmul.mubr.f32.vlgmr.msra.gmra.mrb[0].mxu1 %v91_v11  ;;  %843 = vmatpush3.bf16.msra.mxu0 %v975_v4 }
  0x46   :  { %875 = vmatpush3.bf16.msra.mxu1 %v986_v8  ;;  %845 = vmatprep.subr.bf16.mxu0 %v988_v9 }
  0x47   :  { %877 = vmatprep.subr.bf16.mxu1 %v997_v12 }
  0x49   :  { %847 = vmatpush3.bf16.msra.mxu0 %v988_v9 }
  0x4a   :  { %879 = vmatpush3.bf16.msra.mxu1 %v997_v12  ;;  %849 = vmatprep.subr.bf16.mxu0 %v1016_v21 }
  0x4b   :  { %881 = vmatprep.subr.bf16.mxu1 %v1018_v22 }
  0x4d   :  { %851 = vmatpush3.bf16.msra.mxu0 %v1016_v21 }
  0x4e   :  { %883 = vmatpush3.bf16.msra.mxu1 %v1018_v22  ;;  %853 = vmatprep.subr.bf16.mxu0 %v1087_v41 }
  0x4f   :  { %885 = vmatprep.subr.bf16.mxu1 %v1089_v42 }
  0x51   :  { %855 = vmatpush3.bf16.msra.mxu0 %v1087_v41 }
  0x52   :  { %887 = vmatpush3.bf16.msra.mxu1 %v1089_v42  ;;  %857 = vmatprep.subr.bf16.mxu0 %v792_v49 }
  0x53   :  { %889 = vmatprep.subr.bf16.mxu1 %v824_v50 }
  0x55   :  { %859 = vmatpush3.bf16.msra.mxu0 %v792_v49 }
  0x56   :  { %891 = vmatpush3.bf16.msra.mxu1 %v824_v50  ;;  %861 = vmatprep.subr.bf16.mxu0 %v796_v55 }
  0x57   :  { %893 = vmatprep.subr.bf16.mxu1 %v828_v56 }
  0x59   :  { %863 = vmatpush3.bf16.msra.mxu0 %v796_v55 }
  0x5a   :  { %895 = vmatpush3.bf16.msra.mxu1 %v828_v56  ;;  %865 = vmatprep.subr.bf16.mxu0 %v800_v61 }
  0x5b   :  { %897 = vmatprep.subr.bf16.mxu1 %v832_v62 }
  0x5d   :  { %867 = vmatpush3.bf16.msra.mxu0 %v800_v61 }
  0x5e   :  { %899 = vmatpush3.bf16.msra.mxu1 %v832_v62  ;;  %869 = vmatprep.subr.bf16.mxu0 %v804_v3 }
  0x5f   :  { %901 = vmatprep.subr.bf16.mxu1 %v836_v5 }
  0x61   :  { %871 = vmatpush3.bf16.msra.mxu0 %v804_v3 }
  0x62   :  { %903 = vmatpush3.bf16.msra.mxu1 %v836_v5 }
  0x98   :  { %v69_v4 = vpop.xlane.xlu0 %68  ;;  %v71_v8 = vpop.xlane.xlu1 %70 }
  0x9d   :  { %v73_v12 = vpop.xlane.xlu0 %72  ;;  %v75_v16 = vpop.xlane.xlu1 %74 }
 0x117   :  { %v670_v9 = vpop.f32.mrb[0].mxu0 }
 0x118   :  { %v705_v13 = vpop.f32.mrb[0].mxu1  ;;  %v158_v14 = vpop.f32.mrb[1].mxu0  ;;  %v164_v20 = vadd.f32 %v670_v9, %v71_v8 }
 0x119   :  { %v159_v17 = vadd.f32 %v158_v14, %v69_v4  ;;  %v233_v18 = vpop.f32.mrb[1].mxu1  ;;  %v239_v22 = vadd.f32 %v705_v13, %v75_v16 }
 0x11a   :  { %v234_v19 = vadd.f32 %v233_v18, %v73_v12  ;;  %v249_v27 = vadd.f32 %v563_v15, %v164_v20 }
 0x11b   :  { %v248_v21 = vadd.f32 %v563_v15, %v159_v17  ;;  %v251_v28 = vadd.f32 %v563_v15, %v239_v22 }
 0x11c   :  { %v250_v24 = vadd.f32 %v563_v15, %v234_v19 }
 0x11d   :  { %252 = vmax.xlane.f32.xlu0 %v248_v21 }
 0x11e   :  { %256 = vmax.xlane.f32.xlu1 %v250_v24 }
 0x121   :  { %254 = vmax.xlane.f32.xlu0 %v249_v27 }
 0x122   :  { %258 = vmax.xlane.f32.xlu1 %v251_v28 }
 0x1aa   :  { %v253_v32 = vpop.xlane.xlu0 %252 }
 0x1ab   :  { %v257_v33 = vpop.xlane.xlu1 %256  ;;  %v260_v34 = vsub.f32 %v248_v21, %v253_v32  ;;  %v438_v38 = vadd.f32 %v253_v32, %v58_v31 }
 0x1ac   :  { %v262_v35 = vsub.f32 %v250_v24, %v257_v33  ;;  %v440_v40 = vadd.f32 %v257_v33, %v58_v31 }
 0x1ad   :  { %v264_v37 = vmul.f32 1.442695, %v260_v34  ;;  %v443_v47 = vsel %vm442_vm0, %v438_v38, -inf }
 0x1ae   :  { %v268_v39 = vmul.f32 1.442695, %v262_v35  ;;  %v255_v41 = vpop.xlane.xlu0 %254  ;;  %v452_v50 = vsel %vm442_vm0, %v440_v40, -inf }
 0x1af   :  { %907 = vpow2.f32 %v264_v37  ;;  %v259_v42 = vpop.xlane.xlu1 %258  ;;  %v261_v43 = vsub.f32 %v249_v27, %v255_v41  ;;  %v439_v44 = vadd.f32 %v255_v41, %v59_v36 }
 0x1b0   :  { %909 = vpow2.f32 %v268_v39  ;;  %v263_v45 = vsub.f32 %v251_v28, %v259_v42  ;;  %v441_v46 = vadd.f32 %v259_v42, %v59_v36 }
 0x1b1   :  { %v266_v48 = vmul.f32 1.442695, %v261_v43  ;;  %v444_v49 = vsel %vm442_vm0, %v439_v44, -inf }
 0x1b2   :  { %v270_v51 = vmul.f32 1.442695, %v263_v45  ;;  %v453_v52 = vsel %vm442_vm0, %v441_v46, -inf  ;;  %v445_v53 = vmax.f32 %v443_v47, %v444_v49 }
 0x1b3   :  { %v454_v54 = vmax.f32 %v452_v50, %v453_v52  ;;  %911 = vpow2.f32 %v266_v48 }
 0x1b4   :  { %913 = vpow2.f32 %v270_v51  ;;  %v446_v55 = vrot.slane %v445_v53, 4 }
 0x1b5   :  { %v455_v56 = vrot.slane %v454_v54, 4 }
 0x1b6   :  { %v447_v57 = vmax.f32 %v445_v53, %v446_v55 }
 0x1b7   :  { %v456_v58 = vmax.f32 %v454_v54, %v455_v56 }
 0x1b8   :  { %v448_v59 = vrot.slane %v447_v57, 2 }
 0x1b9   :  { %v1182_v60 = vpop.eup %907  ;;  %v457_v61 = vrot.slane %v456_v58, 2 }
 0x1ba   :  { %v1184_v62 = vpop.eup %909  ;;  %v449_v63 = vmax.f32 %v447_v57, %v448_v59  ;;  %272 = vadd.xlane.f32.xlu0 %v1182_v60 }
 0x1bb   :  { %v458_v0 = vmax.f32 %v456_v58, %v457_v61  ;;  %276 = vadd.xlane.f32.xlu1 %v1184_v62 }
 0x1bc   :  { %v450_v1 = vrot.slane %v449_v63, 1 }
 0x1bd   :  { %v1188_v2 = vpop.eup %911  ;;  %v459_v3 = vrot.slane %v458_v0, 1 }
 0x1be   :  { %v1190_v5 = vpop.eup %913  ;;  %v451_v6 = vmax.f32 %v449_v63, %v450_v1  ;;  %274 = vadd.xlane.f32.xlu0 %v1188_v2 }
 0x1bf   :  { %v460_v7 = vmax.f32 %v458_v0, %v459_v3  ;;  %278 = vadd.xlane.f32.xlu1 %v1190_v5 }
 0x1c0   :  { %v461_v10 = vsub.f32 %v438_v38, %v451_v6  ;;  %v462_v11 = vsub.f32 %v439_v44, %v451_v6 }
 0x1c1   :  { %v463_v4 = vsub.f32 %v440_v40, %v460_v7  ;;  %v464_v8 = vsub.f32 %v441_v46, %v460_v7 }
 0x1c2   :  { %v465_v9 = vmul.f32 1.442695, %v461_v10  ;;  %v467_v14 = vmul.f32 1.442695, %v462_v11 }
 0x1c3   :  { %v469_v12 = vmul.f32 1.442695, %v463_v4  ;;  %v471_v13 = vmul.f32 1.442695, %v464_v8 }
 0x1c4   :  { %915 = vpow2.f32 %v465_v9 }
 0x1c5   :  { %917 = vpow2.f32 %v469_v12 }
 0x1c6   :  { %919 = vpow2.f32 %v471_v13 }
 0x1c7   :  { %921 = vpow2.f32 %v467_v14 }
 0x1ce   :  { %v916_v15 = vpop.eup %915 }
 0x1cf   :  { %v918_v16 = vpop.eup %917  ;;  %v473_v19 = vsel %vm442_vm0, %v916_v15, 0.0 }
 0x1d0   :  { %v920_v17 = vpop.eup %919  ;;  %v482_v18 = vsel %vm442_vm0, %v918_v16, 0.0 }
 0x1d1   :  { %v922_v20 = vpop.eup %921  ;;  %v483_v21 = vsel %vm442_vm0, %v920_v17, 0.0 }
 0x1d2   :  { %v484_v22 = vadd.f32 %v483_v21, %v482_v18  ;;  %v474_v24 = vsel %vm442_vm0, %v922_v20, 0.0 }
 0x1d3   :  { %v475_v27 = vadd.f32 %v474_v24, %v473_v19 }
 0x1d4   :  { %v485_v28 = vrot.slane %v484_v22, 4 }
 0x1d5   :  { %v476_v30 = vrot.slane %v475_v27, 4 }
 0x1d6   :  { %v486_v31 = vadd.f32 %v485_v28, %v484_v22 }
 0x1d7   :  { %v477_v32 = vadd.f32 %v476_v30, %v475_v27 }
 0x1d8   :  { %v487_v33 = vrot.slane %v486_v31, 2 }
 0x1d9   :  { %v478_v34 = vrot.slane %v477_v32, 2 }
 0x1da   :  { %v488_v35 = vadd.f32 %v487_v33, %v486_v31 }
 0x1db   :  { %v479_v36 = vadd.f32 %v478_v34, %v477_v32 }
 0x1dc   :  { %v489_v37 = vrot.slane %v488_v35, 1 }
 0x1dd   :  { %v480_v38 = vrot.slane %v479_v36, 1 }
 0x1de   :  { %v490_v40 = vadd.f32 %v489_v37, %v488_v35 }
 0x1df   :  { %v481_v39 = vadd.f32 %v480_v38, %v479_v36 }
 0x1e1   :  { %923 = vrcp.f32 %v481_v39 }
 0x1e2   :  { %925 = vrcp.f32 %v490_v40 }
 0x1eb   :  { %v924_v41 = vpop.eup %923 }
 0x1ec   :  { %v493_v42 = vmul.f32 %v924_v41, %v922_v20  ;;  %v492_v43 = vmul.f32 %v924_v41, %v916_v15  ;;  %v926_v44 = vpop.eup %925 }
 0x1ed   :  { %v495_v45 = vmul.f32 %v926_v44, %v918_v16  ;;  %v496_v46 = vmul.f32 %v926_v44, %v920_v17 }
 0x1ee   :  { %504 = vperm.xlu1 %906, %v493_v42   ;;  %499 = vperm.xlu0 %905, %v492_v43  }
 0x1f2   :  { %509 = vperm.xlu1 %906, %v495_v45  }
 0x1f6   :  { %514 = vperm.xlu1 %906, %v496_v46  }
 0x247   :  { %v273_v47 = vpop.xlane.xlu0 %272 }
 0x248   :  { %v277_v48 = vpop.xlane.xlu1 %276  ;;  %927 = vrcp.f32 %v273_v47 }
 0x249   :  { %929 = vrcp.f32 %v277_v48 }
 0x24b   :  { %v275_v49 = vpop.xlane.xlu0 %274 }
 0x24c   :  { %v279_v50 = vpop.xlane.xlu1 %278  ;;  %931 = vrcp.f32 %v275_v49 }
 0x24d   :  { %933 = vrcp.f32 %v279_v50 }
 0x252   :  { %v928_v51 = vpop.eup %927 }
 0x253   :  { %v930_v52 = vpop.eup %929  ;;  %v281_v53 = vmul.f32 %v928_v51, %v1182_v60 }
 0x254   :  { %v285_v54 = vmul.f32 %v930_v52, %v1184_v62 }
 0x255   :  { %738 = vmatprep.mubr.f32.mxu0 %v281_v53 }
 0x256   :  { %v932_v55 = vpop.eup %931  ;;  %773 = vmatprep.mubr.f32.mxu1 %v285_v54 }
 0x257   :  { %v934_v56 = vpop.eup %933  ;;  %v283_v57 = vmul.f32 %v932_v55, %v1188_v2 }
 0x258   :  { %v287_v58 = vmul.f32 %v934_v56, %v1190_v5 }
 0x259   :  { %739 = vmatmul.mubr.f32.vlgmr.msra.gmra.mrb[2].mxu0 %v283_v57 }
 0x25a   :  { %774 = vmatmul.mubr.f32.vlgmr.msra.gmra.mrb[2].mxu1 %v287_v58 }
 0x26d   :  { %v505_v59 = vpop.permute.xlu1 %504  ;;  %v500_v61 = vpop.permute.xlu0 %499 }
 0x26e   :  { %v518_v63 = vmul.f32 %v505_v59, %v1040_v26  ;;  %v517_v0 = vmul.f32 %v500_v61, %v1023_v23 }
 0x270   :  { %v521_v1 = vadd.f32 %v518_v63, %v517_v0 }
 0x271   :  { %v510_v60 = vpop.permute.xlu1 %509 }
 0x272   :  { %v522_v3 = vrot.slane %v521_v1, 4  ;;  %v519_v10 = vmul.f32 %v510_v60, %v1035_v25 }
 0x274   :  { %v523_v62 = vadd.f32 %v522_v3, %v521_v1 }
 0x275   :  { %v515_v6 = vpop.permute.xlu1 %514 }
 0x276   :  { %v524_v7 = vrot.slane %v523_v62, 2  ;;  %v520_v2 = vmul.f32 %v515_v6, %v1058_v29 }
 0x278   :  { %v525_v11 = vadd.f32 %v524_v7, %v523_v62  ;;  %v528_v5 = vadd.f32 %v520_v2, %v519_v10 }
 0x27a   :  { %v526_v4 = vrot.slane %v525_v11, 1  ;;  %v529_v8 = vrot.slane %v528_v5, 4 }
 0x27c   :  { %v527_v9 = vadd.f32 %v526_v4, %v525_v11  ;;  %v530_v12 = vadd.f32 %v529_v8, %v528_v5 }
 0x27e   :  { %v551_v13 = vmul.f32 %v527_v9, %v1023_v23  ;;  %v552_v14 = vmul.f32 %v527_v9, %v1040_v26  ;;  %v531_v15 = vrot.slane %v530_v12, 2 }
 0x280   :  { %555 = vst [vmem:[%s1253_s5 + $0x18] sm:$0xff] %v551_v13  ;;  %556 = vst [vmem:[%s1253_s5 + $0x38] sm:$0xff] %v552_v14  ;;  %v532_v16 = vadd.f32 %v531_v15, %v530_v12 }
 0x282   :  { %v533_v17 = vrot.slane %v532_v16, 1 }
 0x284   :  { %v534_v18 = vadd.f32 %v533_v17, %v532_v16 }
 0x286   :  { %v553_v19 = vmul.f32 %v534_v18, %v1035_v25  ;;  %v554_v20 = vmul.f32 %v534_v18, %v1058_v29 }
 0x288   :  { %557 = vst [vmem:[%s1253_s5 + $0x58] sm:$0xff] %v553_v19  ;;  %558 = vst [vmem:[%s1253_s5 + $0x78] sm:$0xff] %v554_v20 }
 0x32c   :  { %v740_v21 = vpop.f32.mrb[2].mxu0 }
 0x32d   :  { %540 = vst [vmem:[%s1253_s5 + $0x28] sm:$0xff] %v740_v21  ;;  %v544_v22 = vmul.f32 %v740_v21, %v1040_v26  ;;  %v775_v24 = vpop.f32.mrb[2].mxu1  ;;  %v354_v27 = vpop.f32.mrb[3].mxu0 }
 0x32e   :  { %542 = vst [vmem:[%s1253_s5 + $0x68] sm:$0xff] %v775_v24  ;;  %v546_v28 = vmul.f32 %v775_v24, %v1058_v29  ;;  %539 = vst [vmem:[%s1253_s5 + $0x8] sm:$0xff] %v354_v27  ;;  %v543_v30 = vmul.f32 %v354_v27, %v1023_v23  ;;  %v429_v31 = vpop.f32.mrb[3].mxu1 }
 0x32f   :  { %548 = vst [vmem:[%s1253_s5 + $0x30] sm:$0xff] %v544_v22  ;;  %541 = vst [vmem:[%s1253_s5 + $0x48] sm:$0xff] %v429_v31  ;;  %v545_v26 = vmul.f32 %v429_v31, %v1035_v25 }
 0x330   :  { %550 = vst [vmem:[%s1253_s5 + $0x70] sm:$0xff] %v546_v28  ;;  %547 = vst [vmem:[%s1253_s5 + $0x10] sm:$0xff] %v543_v30 }
 0x331   :  { %549 = vst [vmem:[%s1253_s5 + $0x50] sm:$0xff] %v545_v26 }

</bundles_post_ra>
